<compile_context>
chip_gen: v6e
topology: v6e:2x2x1
jax: 0.10.0
libtpu: 0.0.40
codegen_flags: <defaults>
</compile_context>

<pallas_src>
import functools

import jax
import jax.numpy as jnp
from jax import lax
from jax.experimental import pallas as pl
from jax.experimental.pallas import tpu as pltpu


# -----------------------------------------------------------------------------
# Pass 1: ChannelRMSNorm + 1x1-conv projections (q/k shared, v), per (b, n-tile, head)
# -----------------------------------------------------------------------------
def _proj_kernel(x_ref, g_ref, w_qk_ref, w_v_ref, q_ref, v_ref):
    _, dim = x_ref.shape
    x = x_ref[...].astype(jnp.float32)                                   # (TP, dim)
    # F.normalize over channels * sqrt(dim) * gamma  (eps matches torch's 1e-12 on the norm)
    inv_nrm = lax.rsqrt(jnp.maximum(jnp.sum(x * x, axis=-1, keepdims=True), 1e-24))
    xn = (x * inv_nrm * (dim ** 0.5) * g_ref[...]).astype(jnp.bfloat16)  # (TP, dim)
    q_ref[...] = jnp.dot(xn, w_qk_ref[...],
                         preferred_element_type=jnp.float32).astype(q_ref.dtype)
    v_ref[...] = jnp.dot(xn, w_v_ref[...],
                         preferred_element_type=jnp.float32).astype(v_ref.dtype)


# -----------------------------------------------------------------------------
# Pass 2: flash-style -||q - k||*scale attention with null kv + fused output proj
# grid = (b, q_tile, head, kv_tile); head & kv axes are sequential ("arbitrary")
# -----------------------------------------------------------------------------
def _attn_kernel(q_ref, k_ref, v_ref, nk_ref, nv_ref, w_o_ref, o_ref,
                 m_ref, l_ref, acc_ref, oacc_ref,
                 *, heads, scale, mask_self_value, tq, tkv):
    qi = pl.program_id(1)
    h = pl.program_id(2)
    kv = pl.program_id(3)
    n_kv = pl.num_programs(3)

    q_bf = q_ref[...]                                        # (TQ, dh) bf16
    q = q_bf.astype(jnp.float32)
    q_sq = jnp.sum(q * q, axis=-1, keepdims=True)            # (TQ, 1)

    # ---- init online softmax with the learned null key/value (the extra column)
    @pl.when(kv == 0)
    def _init():
        nk = nk_ref[...].astype(jnp.float32)                 # (1, dh)
        nv = nv_ref[...].astype(jnp.float32)                 # (1, dh)
        nk_sq = jnp.sum(nk * nk, axis=-1, keepdims=True)     # (1, 1)
        q_nk = jnp.sum(q * nk, axis=-1, keepdims=True)       # (TQ, 1)
        sim_null = -jnp.sqrt(jnp.maximum(q_sq + nk_sq - 2.0 * q_nk, 0.0)) * scale
        m_ref[...] = sim_null                                # running max = null logit
        l_ref[...] = jnp.ones_like(l_ref)                    # exp(sim_null - m) == 1
        acc_ref[...] = jnp.broadcast_to(nv, acc_ref.shape)   # weight-1 null value

        @pl.when(h == 0)
        def _():
            oacc_ref[...] = jnp.zeros_like(oacc_ref)         # cross-head accumulator

    # ---- this KV tile (keys == queries) -----------------------------------
    k_bf = k_ref[...]                                        # (TKV, dh) bf16
    k = k_bf.astype(jnp.float32)
    k_sq = jnp.sum(k * k, axis=-1)[None, :]                  # (1, TKV)

    # bf16 MXU inputs, f32 accumulation (diagonal cancellation case is masked below)
    qq = jnp.einsum('qd,kd->qk', q_bf, k_bf,
                    preferred_element_type=jnp.float32)      # (TQ, TKV)
    d2 = jnp.maximum(q_sq + k_sq - 2.0 * qq, 0.0)
    sim = -jnp.sqrt(d2) * scale                              # (TQ, TKV)

    # tile-local self mask (global diagonal only)
    row = lax.broadcasted_iota(jnp.int32, (tq, tkv), 0) + qi * tq
    col = lax.broadcasted_iota(jnp.int32, (tq, tkv), 1) + kv * tkv
    sim = jnp.where(row == col, mask_self_value, sim)

    # ---- online softmax update ---------------------------------------------
    m_prev = m_ref[...]
    m_new = jnp.maximum(m_prev, jnp.max(sim, axis=-1, keepdims=True))
    alpha = jnp.exp(m_prev - m_new)
    p = jnp.exp(sim - m_new)                                 # (TQ, TKV) f32
    l_ref[...] = alpha * l_ref[...] + jnp.sum(p, axis=-1, keepdims=True)
    acc_ref[...] = alpha * acc_ref[...] + jnp.dot(
        p.astype(jnp.bfloat16), v_ref[...], preferred_element_type=jnp.float32)
    m_ref[...] = m_new

    # ---- finalize this head: normalize + per-head slice of the output projection
    @pl.when(kv == n_kv - 1)
    def _finalize():
        out_h = (acc_ref[...] * pl.reciprocal(l_ref[...], approx=True)).astype(jnp.bfloat16)
        oacc_ref[...] += jnp.dot(out_h, w_o_ref[...],
                                 preferred_element_type=jnp.float32)     # (TQ, dim)

        @pl.when(h == heads - 1)
        def _():
            o_ref[...] = oacc_ref[...].astype(o_ref.dtype)


# -----------------------------------------------------------------------------
# Wrapper
# -----------------------------------------------------------------------------
def _pick_tile(n, target):
    """Largest divisor of n that is <= target and a multiple of 8; falls back to n."""
    best = 0
    for d in range(8, min(n, target) + 1, 8):
        if n % d == 0:
            best = d
    return best if best else n


def _vmem_limit_bytes():
    cap = 64 * 1024 * 1024                       # conservative fallback (v7x physical VMEM)
    try:
        cap = int(pltpu.get_tpu_info().vmem_capacity_bytes)
    except Exception:
        pass
    # ~25% headroom for double-buffered pipeline blocks / compiler scratch;
    # => ~48 MiB on v7x, ~96 MiB on the 128 MiB parts (v5e / v6e).
    return max(32 * 1024 * 1024, min((cap * 3) // 4, 100 * 1024 * 1024))


def self_attention_forward(params, fmap, *, tq=None, tkv=None, tp=None):
    """fmap: (b, dim, H, W) float32 -> (b, dim, H, W), matching the PyTorch module."""
    b, dim, H, W = fmap.shape
    heads, dim_head = params["heads"], params["dim_head"]
    n = H * W
    scale = dim_head ** -0.5

    # Tile choices: 256-aligned q tiles / larger kv tiles suit the v6e/v7x 256x256 MXU;
    # pass tq=tkv=128 on v5e (128x128 MXU).
    tp = tp if tp is not None else _pick_tile(n, 512)
    tq = tq if tq is not None else _pick_tile(n, 256)
    tkv = tkv if tkv is not None else _pick_tile(n, 512)
    assert n % tp == 0 and n % tq == 0 and n % tkv == 0

    # NCHW -> channel-last tokens (wrapper-side layout plumbing only).
    x = jnp.transpose(fmap, (0, 2, 3, 1)).reshape(b, n, dim)

    # Head-major weights so the kernels never transpose activations.
    w_qk = params["w_qk"].reshape(dim, heads, dim_head).transpose(1, 0, 2).astype(jnp.bfloat16)
    w_v = params["w_v"].reshape(dim, heads, dim_head).transpose(1, 0, 2).astype(jnp.bfloat16)
    w_o = params["w_o"].reshape(heads, dim_head, dim).astype(jnp.bfloat16)
    nk = params["nk"].reshape(heads, 1, dim_head).astype(jnp.float32)
    nv = params["nv"].reshape(heads, 1, dim_head).astype(jnp.float32)

    vmem_limit = _vmem_limit_bytes()

    # ---- pass 1: RMSNorm + projections (computed once, not per query tile) ----
    qv_shape = jax.ShapeDtypeStruct((b, heads, n, dim_head), jnp.bfloat16)
    q_arr, v_arr = pl.pallas_call(
        _proj_kernel,
        out_shape=(qv_shape, qv_shape),
        grid=(b, n // tp, heads),
        in_specs=[
            pl.BlockSpec((None, tp, dim), lambda bi, ti, h: (bi, ti, 0)),       # x tile
            pl.BlockSpec((1, dim), lambda bi, ti, h: (0, 0)),                   # gamma
            pl.BlockSpec((None, dim, dim_head), lambda bi, ti, h: (h, 0, 0)),   # W_qk[h]
            pl.BlockSpec((None, dim, dim_head), lambda bi, ti, h: (h, 0, 0)),   # W_v[h]
        ],
        out_specs=(
            pl.BlockSpec((None, None, tp, dim_head), lambda bi, ti, h: (bi, h, ti, 0)),
            pl.BlockSpec((None, None, tp, dim_head), lambda bi, ti, h: (bi, h, ti, 0)),
        ),
        compiler_params=pltpu.CompilerParams(
            dimension_semantics=("parallel", "parallel", "parallel"),
            vmem_limit_bytes=vmem_limit,
        ),
    )(x, params["gamma"], w_qk, w_v)

    # ---- pass 2: flash-style attention + fused output projection ----
    kernel = functools.partial(
        _attn_kernel, heads=heads, scale=scale,
        mask_self_value=float(params["mask_self_value"]), tq=tq, tkv=tkv)

    out = pl.pallas_call(
        kernel,
        out_shape=jax.ShapeDtypeStruct((b, n, dim), fmap.dtype),
        grid=(b, n // tq, heads, n // tkv),
        in_specs=[
            pl.BlockSpec((None, None, tq, dim_head),
                         lambda bi, qi, h, kv: (bi, h, qi, 0)),    # q tile
            pl.BlockSpec((None, None, tkv, dim_head),
                         lambda bi, qi, h, kv: (bi, h, kv, 0)),    # k tile (keys == queries)
            pl.BlockSpec((None, None, tkv, dim_head),
                         lambda bi, qi, h, kv: (bi, h, kv, 0)),    # v tile
            pl.BlockSpec((None, 1, dim_head), lambda bi, qi, h, kv: (h, 0, 0)),  # null k[h]
            pl.BlockSpec((None, 1, dim_head), lambda bi, qi, h, kv: (h, 0, 0)),  # null v[h]
            pl.BlockSpec((None, dim_head, dim), lambda bi, qi, h, kv: (h, 0, 0)),  # W_out[h]
        ],
        out_specs=pl.BlockSpec((None, tq, dim), lambda bi, qi, h, kv: (bi, qi, 0)),
        scratch_shapes=[
            pltpu.VMEM((tq, 1), jnp.float32),         # running max m
            pltpu.VMEM((tq, 1), jnp.float32),         # running denominator l
            pltpu.VMEM((tq, dim_head), jnp.float32),  # per-head PV accumulator
            pltpu.VMEM((tq, dim), jnp.float32),       # cross-head projected output
        ],
        compiler_params=pltpu.CompilerParams(
            dimension_semantics=("parallel", "parallel", "arbitrary", "arbitrary"),
            vmem_limit_bytes=vmem_limit,
        ),
    )(q_arr, q_arr, v_arr, nk, nv, w_o)

    return jnp.transpose(out.reshape(b, H, W, dim), (0, 3, 1, 2))


# -----------------------------------------------------------------------------
# Parameters + pure-JAX reference (mirror of the PyTorch forward), for validation
# -----------------------------------------------------------------------------
def init_params(key, dim, dim_head=64, heads=8, mask_self_value=-100.0):
    inner = dim_head * heads
    k1, k2, k3, k4 = jax.random.split(key, 4)
    null_kv = jax.random.normal(k4, (2, heads, dim_head), jnp.float32)
    return dict(
        gamma=jnp.ones((1, dim), jnp.float32),
        w_qk=jax.random.normal(k1, (dim, inner), jnp.float32) * 0.05,
        w_v=jax.random.normal(k2, (dim, inner), jnp.float32) * 0.05,
        w_o=jax.random.normal(k3, (inner, dim), jnp.float32) * 0.05,
        nk=null_kv[0],
        nv=null_kv[1],
        heads=heads,
        dim_head=dim_head,
        mask_self_value=mask_self_value,
    )


def self_attention_ref(params, fmap):
    heads, dh = params["heads"], params["dim_head"]
    b, dim, H, W = fmap.shape
    n = H * W
    scale = dh ** -0.5

    nrm = jnp.linalg.norm(fmap, axis=1, keepdims=True)
    fm = fmap / jnp.maximum(nrm, 1e-12) * (dim ** 0.5) * params["gamma"].reshape(1, dim, 1, 1)
    xcl = jnp.transpose(fm, (0, 2, 3, 1)).reshape(b, n, dim)

    qk = (xcl @ params["w_qk"]).reshape(b, n, heads, dh).transpose(0, 2, 1, 3).reshape(b * heads, n, dh)
    v = (xcl @ params["w_v"]).reshape(b, n, heads, dh).transpose(0, 2, 1, 3).reshape(b * heads, n, dh)
    nk = jnp.tile(params["nk"][None], (b, 1, 1)).reshape(b * heads, 1, dh)
    nv = jnp.tile(params["nv"][None], (b, 1, 1)).reshape(b * heads, 1, dh)
    k = jnp.concatenate([nk, qk], axis=1)
    vv = jnp.concatenate([nv, v], axis=1)

    d2 = (jnp.sum(qk ** 2, -1, keepdims=True) + jnp.sum(k ** 2, -1)[:, None, :]
          - 2.0 * jnp.einsum('bid,bjd->bij', qk, k))
    sim = -jnp.sqrt(jnp.maximum(d2, 0.0)) * scale
    eye = jnp.pad(jnp.eye(n, dtype=bool), ((0, 0), (1, 0)))
    sim = jnp.where(eye[None], params["mask_self_value"], sim)
    attn = jax.nn.softmax(sim, axis=-1)
    out = jnp.einsum('bij,bjd->bid', attn, vv)
    out = out.reshape(b, heads, n, dh).transpose(0, 2, 1, 3).reshape(b, n, heads * dh)
    out = out @ params["w_o"]
    return jnp.transpose(out.reshape(b, H, W, dim), (0, 3, 1, 2))


if __name__ == "__main__":
    key = jax.random.PRNGKey(0)
    batch, dim, H, W = 2, 32, 16, 16        # n = 256 tokens
    heads, dim_head = 4, 16

    kp, kx = jax.random.split(key)
    params = init_params(kp, dim, dim_head=dim_head, heads=heads)
    fmap = jax.random.normal(kx, (batch, dim, H, W), jnp.float32)

    # tq = tkv = 128 so the multi-tile online-softmax and cross-head accumulation
    # paths are exercised even at this small n.
    out = jax.block_until_ready(self_attention_forward(params, fmap, tq=128, tkv=128))
    ref = self_attention_ref(params, fmap)

    assert out.shape == (batch, dim, H, W)
    max_err = float(jnp.max(jnp.abs(out - ref)))
    # bf16 q/k/v storage + bf16 MXU inputs (f32 accumulation) + approx reciprocal.
    assert jnp.allclose(out, ref, atol=2e-2, rtol=2e-2), max_err
    print("KERNEL_OK")
</pallas_src>

<mosaic_0001>
module attributes {stable_mosaic.version = 11 : i64} {
  func.func @_proj_kernel(%arg0: i32, %arg1: i32, %arg2: i32, %arg3: memref<1x256x32xf32, #tpu.memory_space<vmem>>, %arg4: memref<1x32xf32, #tpu.memory_space<vmem>>, %arg5: memref<1x32x16xbf16, #tpu.memory_space<vmem>>, %arg6: memref<1x32x16xbf16, #tpu.memory_space<vmem>>, %arg7: memref<1x1x256x16xbf16, #tpu.memory_space<vmem>>, %arg8: memref<1x1x256x16xbf16, #tpu.memory_space<vmem>>) attributes {dimension_semantics = [#tpu.dimension_semantics<parallel>, #tpu.dimension_semantics<parallel>, #tpu.dimension_semantics<parallel>], iteration_bounds = array<i64: 2, 1, 4>, scalar_prefetch = 0 : i64, scratch_operands = 0 : i64, tpu.core_type = #tpu.core_type<tc>, window_params = [{transform_indices = @transform_0, window_bounds = array<i64: 1, 256, 32>}, {pipeline_mode = #tpu.pipeline_mode<synchronous>, transform_indices = @transform_1, window_bounds = array<i64: 1, 32>}, {transform_indices = @transform_2, window_bounds = array<i64: 1, 32, 16>}, {transform_indices = @transform_3, window_bounds = array<i64: 1, 32, 16>}, {transform_indices = @transform_4, window_bounds = array<i64: 1, 1, 256, 16>}, {transform_indices = @transform_5, window_bounds = array<i64: 1, 1, 256, 16>}]} {
    %c0 = arith.constant 0 : index
    %c0_0 = arith.constant 0 : index
    %c0_1 = arith.constant 0 : index
    %0 = vector.load %arg3[%c0, %c0_0, %c0_1] : memref<1x256x32xf32, #tpu.memory_space<vmem>>, vector<1x256x32xf32>
    %1 = vector.shape_cast %0 : vector<1x256x32xf32> to vector<256x32xf32>
    %2 = arith.mulf %1, %1 : vector<256x32xf32>
    %cst = arith.constant dense<0.000000e+00> : vector<256xf32>
    %3 = vector.multi_reduction <add>, %2, %cst [1] : vector<256x32xf32> to vector<256xf32>
    %4 = vector.shape_cast %3 : vector<256xf32> to vector<256x1xf32>
    %cst_2 = arith.constant 1.000000e-24 : f32
    %5 = vector.broadcast %cst_2 : f32 to vector<256x1xf32>
    %6 = arith.maximumf %4, %5 : vector<256x1xf32>
    %7 = math.rsqrt %6 : vector<256x1xf32>
    %8 = vector.broadcast %7 : vector<256x1xf32> to vector<256x32xf32>
    %9 = arith.mulf %1, %8 : vector<256x32xf32>
    %cst_3 = arith.constant 5.65685415 : f32
    %10 = vector.broadcast %cst_3 : f32 to vector<256x32xf32>
    %11 = arith.mulf %9, %10 : vector<256x32xf32>
    %c0_4 = arith.constant 0 : index
    %c0_5 = arith.constant 0 : index
    %12 = vector.load %arg4[%c0_4, %c0_5] : memref<1x32xf32, #tpu.memory_space<vmem>>, vector<1x32xf32>
    %13 = vector.broadcast %12 : vector<1x32xf32> to vector<256x32xf32>
    %14 = arith.mulf %11, %13 : vector<256x32xf32>
    %15 = arith.truncf %14 : vector<256x32xf32> to vector<256x32xbf16>
    %c0_6 = arith.constant 0 : index
    %c0_7 = arith.constant 0 : index
    %c0_8 = arith.constant 0 : index
    %16 = vector.load %arg5[%c0_6, %c0_7, %c0_8] : memref<1x32x16xbf16, #tpu.memory_space<vmem>>, vector<1x32x16xbf16>
    %17 = vector.shape_cast %16 : vector<1x32x16xbf16> to vector<32x16xbf16>
    %cst_9 = arith.constant dense<0.000000e+00> : vector<256x16xf32>
    %18 = tpu.matmul %15, %17, %cst_9 {dimension_numbers = #tpu.dot_dimension_numbers<[1], [0], [0], [1], [0, 0, 1, 1], [], []>} : vector<256x32xbf16>, vector<32x16xbf16>, vector<256x16xf32> -> vector<256x16xf32>
    %19 = arith.truncf %18 : vector<256x16xf32> to vector<256x16xbf16>
    %c0_10 = arith.constant 0 : index
    %c0_11 = arith.constant 0 : index
    %c0_12 = arith.constant 0 : index
    %c0_13 = arith.constant 0 : index
    %20 = vector.load %arg7[%c0_10, %c0_11, %c0_12, %c0_13] : memref<1x1x256x16xbf16, #tpu.memory_space<vmem>>, vector<1x1x256x16xbf16>
    %21 = vector.shape_cast %20 : vector<1x1x256x16xbf16> to vector<256x16xbf16>
    %22 = vector.shape_cast %19 : vector<256x16xbf16> to vector<1x1x256x16xbf16>
    tpu.vector_store %arg7[%c0_10, %c0_11, %c0_12, %c0_13], %22 {strides = array<i32>} : memref<1x1x256x16xbf16, #tpu.memory_space<vmem>>, vector<1x1x256x16xbf16>,
    %c0_14 = arith.constant 0 : index
    %c0_15 = arith.constant 0 : index
    %c0_16 = arith.constant 0 : index
    %23 = vector.load %arg6[%c0_14, %c0_15, %c0_16] : memref<1x32x16xbf16, #tpu.memory_space<vmem>>, vector<1x32x16xbf16>
    %24 = vector.shape_cast %23 : vector<1x32x16xbf16> to vector<32x16xbf16>
    %cst_17 = arith.constant dense<0.000000e+00> : vector<256x16xf32>
    %25 = tpu.matmul %15, %24, %cst_17 {dimension_numbers = #tpu.dot_dimension_numbers<[1], [0], [0], [1], [0, 0, 1, 1], [], []>} : vector<256x32xbf16>, vector<32x16xbf16>, vector<256x16xf32> -> vector<256x16xf32>
    %26 = arith.truncf %25 : vector<256x16xf32> to vector<256x16xbf16>
    %c0_18 = arith.constant 0 : index
    %c0_19 = arith.constant 0 : index
    %c0_20 = arith.constant 0 : index
    %c0_21 = arith.constant 0 : index
    %27 = vector.load %arg8[%c0_18, %c0_19, %c0_20, %c0_21] : memref<1x1x256x16xbf16, #tpu.memory_space<vmem>>, vector<1x1x256x16xbf16>
    %28 = vector.shape_cast %27 : vector<1x1x256x16xbf16> to vector<256x16xbf16>
    %29 = vector.shape_cast %26 : vector<256x16xbf16> to vector<1x1x256x16xbf16>
    tpu.vector_store %arg8[%c0_18, %c0_19, %c0_20, %c0_21], %29 {strides = array<i32>} : memref<1x1x256x16xbf16, #tpu.memory_space<vmem>>, vector<1x1x256x16xbf16>,
    return
  }
  func.func @transform_0(%arg0: i32, %arg1: i32, %arg2: i32) -> (i32, i32, i32) {
    %c0_i32 = arith.constant 0 : i32
    %c0_i32_0 = arith.constant 0 : i32
    return %arg0, %arg1, %c0_i32 : i32, i32, i32
  }
  func.func @transform_1(%arg0: i32, %arg1: i32, %arg2: i32) -> (i32, i32) {
    %c0_i32 = arith.constant 0 : i32
    %c0_i32_0 = arith.constant 0 : i32
    %c0_i32_1 = arith.constant 0 : i32
    return %c0_i32, %c0_i32_0 : i32, i32
  }
  func.func @transform_2(%arg0: i32, %arg1: i32, %arg2: i32) -> (i32, i32, i32) {
    %c0_i32 = arith.constant 0 : i32
    %c0_i32_0 = arith.constant 0 : i32
    %c0_i32_1 = arith.constant 0 : i32
    return %arg2, %c0_i32, %c0_i32_0 : i32, i32, i32
  }
  func.func @transform_3(%arg0: i32, %arg1: i32, %arg2: i32) -> (i32, i32, i32) {
    %c0_i32 = arith.constant 0 : i32
    %c0_i32_0 = arith.constant 0 : i32
    %c0_i32_1 = arith.constant 0 : i32
    return %arg2, %c0_i32, %c0_i32_0 : i32, i32, i32
  }
  func.func @transform_4(%arg0: i32, %arg1: i32, %arg2: i32) -> (i32, i32, i32, i32) {
    %c0_i32 = arith.constant 0 : i32
    %c0_i32_0 = arith.constant 0 : i32
    return %arg0, %arg2, %arg1, %c0_i32 : i32, i32, i32, i32
  }
  func.func @transform_5(%arg0: i32, %arg1: i32, %arg2: i32) -> (i32, i32, i32, i32) {
    %c0_i32 = arith.constant 0 : i32
    %c0_i32_0 = arith.constant 0 : i32
    return %arg0, %arg2, %arg1, %c0_i32 : i32, i32, i32, i32
  }
}

</mosaic_0001>

<bundles_post_ra>
// kernel: tpu_custom_call.1
= control target key start
LH: loop header
LB: loop body
LE: loop exit
PB: predicated region body
PF: predicated region fallthrough
CT: control target
= control target key end

     0   :  { %s2095_s18 = smov 0   ;;  %s2097_s19 = smov 0   ;;  %s2593_s0 = inlined_call_operand.vmem [shape: f32[2,256,32], index: 0, kind: input, shape index: {}]   ;;  %s2594_s1 = inlined_call_operand.vmem [shape: f32[1,32], index: 1, kind: input, shape index: {}]   ;;  %s2595_s2 = inlined_call_operand.vmem [shape: bf16[4,32,16], index: 2, kind: input, shape index: {}]   ;;  %s2596_s3 = inlined_call_operand.vmem [shape: bf16[4,32,16], index: 3, kind: input, shape index: {}]   ;;  %s2597_s4 = inlined_call_operand.vmem [shape: bf16[2,4,256,16], index: 4, kind: output, shape index: {0}]   ;;  %s2598_s5 = inlined_call_operand.vmem [shape: bf16[2,4,256,16], index: 5, kind: output, shape index: {1}]  }
   0x1   :  { %s2099_s20 = smov 0   ;;  %s2101_s21 = smov 0  }
   0x2   :  { %s2103_s22 = smov 0  }
   0x3 LB: > { %s28_s23 = sadd.s32 1, %s2055_s20  ;;  %s35_s24 = sadd.s32 1, %s2059_s21  ;;  %s2063_s22 = sphi %s2103_s22, %s16_s22   ;;  %s2059_s21 = sphi %s2101_s21, %s2602_s21   ;;  %s2055_s20 = sphi %s2099_s20, %s2601_s20   ;;  %s2051_s19 = sphi %s2097_s19, %s2600_s19   ;;  %s2047_s18 = sphi %s2095_s18, %s2599_s18  }
   0x4   : > { %p29_p0 = scmp.ge.s32.totalorder %s28_s23, 4  ;;  %p1626_p1 = scmp.ge.s32.totalorder %s2063_s22, 1 }
   0x5   : > { %p244_p2 = scmp.lt.s32.totalorder %s2063_s22, 9 }
   0x6   : > { %s2604_s23 = smov (%p29_p0, %s28_s23), 0  ;;  %s2606_s24 = smov (!%p29_p0, %s35_s24), %s2059_s21 }
   0x7   : > { %p245_p3 = pnand %p1626_p1, %p244_p2  ;;  %p37_p4 = scmp.ge.s32.totalorder %s2606_s24, 2 }
   0x8   : > { %p308_p5 = scmp.lt.s32.totalorder (!%p245_p3), %s2051_s19, 1  ;;  %p317_p6 = scmp.lt.s32.totalorder (!%p245_p3), %s2047_s18, 3 }
   0x9   : > { %s2608_s24 = smov (%p37_p4, %s2606_s24), 0  ;;  %248 = sbr.rel (%p245_p3) target bundleno = 447 (0x1bf), region = 36 }
   0xe   : > { %s2610_s19 = smov (!%p308_p5, %s2051_s19), 1  ;;  %vm420_vm0 = vcmask 261120   ;;  %s2612_s18 = smov (!%p317_p6, %s2047_s18), 3  ;;  %vm1053_vm1 = vcmask 125952  }
   0xf   : > { %s1742_s25 = sshll.u32 %s2610_s19, 8  ;;  %s1743_s29 = sshll.u32 %s2612_s18, 4 }
  0x10   : > { %s2133_s28 = scalar_lea.vmem %s2593_s0, %s1742_s25  ;;  %s321_s7 = scalar_lea.vmem %s2595_s2, %s1743_s29 }
  0x11   : > { %v2136_v0 = vld [vmem:[%s2133_s28 + $0x10] sm:$0xff]  ;;  %v2139_v1 = vld [vmem:[%s2133_s28] sm:$0xff]  ;;  %v2142_v2 = vld [vmem:[%s2133_s28 + $0x18] sm:$0xff]  ;;  %s326_s10 = scalar_lea.vmem %s2596_s3, %s1743_s29  ;;  %s1633_s11 = sshll.u32 %s2612_s18, 5 }
  0x12   : > { %v390_v3 = vmul.f32 %v2136_v0, %v2136_v0  ;;  %v388_v4 = vmul.f32 %v2139_v1, %v2139_v1  ;;  %v391_v5 = vmul.f32 %v2142_v2, %v2142_v2  ;;  %v2151_v6 = vld [vmem:[%s2133_s28 + $0x8] sm:$0xff]  ;;  %v2159_v9 = vld [vmem:[%s2133_s28 + $0x20] sm:$0xff]  ;;  %v2170_v16 = vld [vmem:[%s2133_s28 + $0x38] sm:$0xff]  ;;  %s1634_s12 = sshll.u32 %s2610_s19, 7 }
  0x13   : > { %v389_v7 = vmul.f32 %v2151_v6, %v2151_v6  ;;  %v2156_v8 = vld [vmem:[%s2133_s28 + $0x28] sm:$0xff]  ;;  %v392_v15 = vmul.f32 %v2159_v9, %v2159_v9  ;;  %v2173_v17 = vld [vmem:[%s2133_s28 + $0x30] sm:$0xff]  ;;  %v395_v20 = vmul.f32 %v2170_v16, %v2170_v16  ;;  %v2185_v23 = vld [vmem:[%s2133_s28 + $0x40] sm:$0xff]  ;;  %s2280_s13 = sadd.s32 %s1634_s12, %s1633_s11 }
  0x14   : > { %v427_v10 = vsel %vm420_vm0, %v390_v3, 0.0  ;;  %v421_v11 = vsel %vm420_vm0, %v388_v4, 0.0  ;;  %v430_v12 = vsel %vm420_vm0, %v391_v5, 0.0  ;;  %v393_v14 = vmul.f32 %v2156_v8, %v2156_v8  ;;  %v2182_v22 = vld [vmem:[%s2133_s28 + $0x48] sm:$0xff]  ;;  %v2194_v28 = vld [vmem:[%s2133_s28 + $0x58] sm:$0xff]  ;;  %v2197_v29 = vld [vmem:[%s2133_s28 + $0x50] sm:$0xff] }
  0x15   : > { %428 = vadd.xlane.f32.xlu1 %v427_v10  ;;  %422 = vadd.xlane.f32.xlu0 %v421_v11  ;;  %v424_v13 = vsel %vm420_vm0, %v389_v7, 0.0  ;;  %v433_v19 = vsel %vm420_vm0, %v392_v15, 0.0  ;;  %v394_v21 = vmul.f32 %v2173_v17, %v2173_v17  ;;  %v442_v24 = vsel %vm420_vm0, %v395_v20, 0.0  ;;  %v2206_v34 = vld [vmem:[%s2133_s28 + $0x68] sm:$0xff]  ;;  %v2209_v35 = vld [vmem:[%s2133_s28 + $0x60] sm:$0xff]  ;;  %v2218_v40 = vld [vmem:[%s2133_s28 + $0x78] sm:$0xff] }
  0x16   : > { %v436_v18 = vsel %vm420_vm0, %v393_v14, 0.0  ;;  %v397_v26 = vmul.f32 %v2182_v22, %v2182_v22  ;;  %v396_v27 = vmul.f32 %v2185_v23, %v2185_v23  ;;  %v399_v32 = vmul.f32 %v2194_v28, %v2194_v28  ;;  %v2221_v41 = vld [vmem:[%s2133_s28 + $0x70] sm:$0xff]  ;;  %v2230_v46 = vld [vmem:[%s2133_s28 + $0x88] sm:$0xff]  ;;  %v2233_v47 = vld [vmem:[%s2133_s28 + $0x80] sm:$0xff]  ;;  %s1635_s16 = sshll.u32 %s2280_s13, 2 }
  0x17   : > { %v439_v25 = vsel %vm420_vm0, %v394_v21, 0.0  ;;  %v398_v33 = vmul.f32 %v2197_v29, %v2197_v29  ;;  %v401_v38 = vmul.f32 %v2206_v34, %v2206_v34  ;;  %v400_v39 = vmul.f32 %v2209_v35, %v2209_v35  ;;  %v2243_v52 = vld [vmem:[%s2133_s28 + $0x98] sm:$0xff]  ;;  %v2246_v53 = vld [vmem:[%s2133_s28 + $0x90] sm:$0xff]  ;;  %v2256_v58 = vld [vmem:[%s2133_s28 + $0xa8] sm:$0xff]  ;;  %s2443_s19 = scalar_lea.vmem %s2597_s4, %s1635_s16  ;;  %s2448_s27 = scalar_lea.vmem %s2598_s5, %s1635_s16 }
  0x18   : > { %v448_v30 = vsel %vm420_vm0, %v397_v26, 0.0  ;;  %v445_v31 = vsel %vm420_vm0, %v396_v27, 0.0  ;;  %v454_v36 = vsel %vm420_vm0, %v399_v32, 0.0  ;;  %v403_v44 = vmul.f32 %v2218_v40, %v2218_v40  ;;  %v2259_v59 = vld [vmem:[%s2133_s28 + $0xa0] sm:$0xff]  ;;  %v1957_v60 = vld [vmem:[%s321_s7 + $0x8] sm:$0xff]   ;;  %v2268_v62 = vld [vmem:[%s2133_s28 + $0xb8] sm:$0xff] }
  0x19   : > { %431 = vadd.xlane.f32.xlu1 %v430_v12  ;;  %425 = vadd.xlane.f32.xlu0 %v424_v13  ;;  %v451_v37 = vsel %vm420_vm0, %v398_v33, 0.0  ;;  %v460_v42 = vsel %vm420_vm0, %v401_v38, 0.0  ;;  %v457_v43 = vsel %vm420_vm0, %v400_v39, 0.0  ;;  %v402_v45 = vmul.f32 %v2221_v41, %v2221_v41  ;;  %v1958_v61 = vld [vmem:[%s326_s10 + $0x8] sm:$0xff]   ;;  %v2278_v7 = vld [vmem:[%s2133_s28 + $0xb0] sm:$0xff]  ;;  %v1959_v10 = vld [vmem:[%s321_s7] sm:$0xff]  }
  0x1a   : > { %v466_v48 = vsel %vm420_vm0, %v403_v44, 0.0  ;;  %v405_v50 = vmul.f32 %v2230_v46, %v2230_v46  ;;  %v404_v51 = vmul.f32 %v2233_v47, %v2233_v47  ;;  %v407_v56 = vmul.f32 %v2243_v52, %v2243_v52  ;;  %1845 = vmatprep.subr.bf16.mxu0 %v1957_v60  ;;  %1881 = vmatprep.subr.bf16.mxu1 %v1958_v61  ;;  %v1960_v11 = vld [vmem:[%s326_s10] sm:$0xff]   ;;  %v2301_v26 = vld [vmem:[%s2133_s28 + $0xd8] sm:$0xff]  ;;  %v2304_v27 = vld [vmem:[%s2133_s28 + $0xd0] sm:$0xff] }
  0x1b   : > { %v463_v49 = vsel %vm420_vm0, %v402_v45, 0.0  ;;  %v406_v57 = vmul.f32 %v2246_v53, %v2246_v53  ;;  %v409_v4 = vmul.f32 %v2256_v58, %v2256_v58  ;;  %v408_v5 = vmul.f32 %v2259_v59, %v2259_v59  ;;  %1846 = vmatpush3.bf16.msra.mxu0 %v1957_v60  ;;  %1882 = vmatpush3.bf16.msra.mxu1 %v1958_v61  ;;  %v2325_v44 = vld [vmem:[%s2133_s28 + $0xf8] sm:$0xff]  ;;  %v2328_v45 = vld [vmem:[%s2133_s28 + $0xf0] sm:$0xff] }
  0x1c   : > { %v472_v54 = vsel %vm420_vm0, %v405_v50, 0.0  ;;  %v469_v55 = vsel %vm420_vm0, %v404_v51, 0.0  ;;  %v478_v63 = vsel %vm420_vm0, %v407_v56, 0.0  ;;  %v411_v14 = vmul.f32 %v2268_v62, %v2268_v62  ;;  %1847 = vmatprep.subr.bf16.mxu0 %v1959_v10  ;;  %1883 = vmatprep.subr.bf16.mxu1 %v1960_v11 }
  0x1d   : > { %437 = vadd.xlane.f32.xlu1 %v436_v18  ;;  %434 = vadd.xlane.f32.xlu0 %v433_v19  ;;  %v475_v3 = vsel %vm420_vm0, %v406_v57, 0.0  ;;  %v484_v12 = vsel %vm420_vm0, %v409_v4, 0.0  ;;  %v481_v13 = vsel %vm420_vm0, %v408_v5, 0.0  ;;  %v410_v15 = vmul.f32 %v2278_v7, %v2278_v7  ;;  %v2289_v18 = vld [vmem:[%s2133_s28 + $0xc8] sm:$0xff]  ;;  %v2292_v19 = vld [vmem:[%s2133_s28 + $0xc0] sm:$0xff] }
  0x1e   : > { %v490_v20 = vsel %vm420_vm0, %v411_v14, 0.0  ;;  %v415_v32 = vmul.f32 %v2301_v26, %v2301_v26  ;;  %v414_v33 = vmul.f32 %v2304_v27, %v2304_v27  ;;  %v419_v50 = vmul.f32 %v2325_v44, %v2325_v44 }
  0x1f   : > { %1848 = vmatpush3.bf16.msra.mxu0 %v1959_v10  ;;  %1884 = vmatpush3.bf16.msra.mxu1 %v1960_v11  ;;  %v487_v21 = vsel %vm420_vm0, %v410_v15, 0.0  ;;  %v418_v51 = vmul.f32 %v2328_v45, %v2328_v45 }
  0x20   : > { %v502_v38 = vsel %vm420_vm0, %v415_v32, 0.0  ;;  %v499_v39 = vsel %vm420_vm0, %v414_v33, 0.0 }
  0x21   : > { %443 = vadd.xlane.f32.xlu1 %v442_v24  ;;  %440 = vadd.xlane.f32.xlu0 %v439_v25  ;;  %v413_v24 = vmul.f32 %v2289_v18, %v2289_v18  ;;  %v412_v25 = vmul.f32 %v2292_v19, %v2292_v19 }
  0x25   : > { %449 = vadd.xlane.f32.xlu1 %v448_v30  ;;  %446 = vadd.xlane.f32.xlu0 %v445_v31  ;;  %v496_v30 = vsel %vm420_vm0, %v413_v24, 0.0  ;;  %v493_v31 = vsel %vm420_vm0, %v412_v25, 0.0 }
  0x29   : > { %455 = vadd.xlane.f32.xlu1 %v454_v36  ;;  %452 = vadd.xlane.f32.xlu0 %v451_v37  ;;  %v2313_v36 = vld [vmem:[%s2133_s28 + $0xe8] sm:$0xff]  ;;  %v2316_v37 = vld [vmem:[%s2133_s28 + $0xe0] sm:$0xff] }
  0x2d   : > { %461 = vadd.xlane.f32.xlu1 %v460_v42  ;;  %458 = vadd.xlane.f32.xlu0 %v457_v43  ;;  %v417_v42 = vmul.f32 %v2313_v36, %v2313_v36  ;;  %v416_v43 = vmul.f32 %v2316_v37, %v2316_v37 }
  0x31   : > { %467 = vadd.xlane.f32.xlu1 %v466_v48  ;;  %464 = vadd.xlane.f32.xlu0 %v463_v49  ;;  %v508_v48 = vsel %vm420_vm0, %v417_v42, 0.0  ;;  %v505_v49 = vsel %vm420_vm0, %v416_v43, 0.0 }
  0x35   : > { %473 = vadd.xlane.f32.xlu1 %v472_v54  ;;  %470 = vadd.xlane.f32.xlu0 %v469_v55  ;;  %v514_v54 = vsel %vm420_vm0, %v419_v50, 0.0  ;;  %v511_v55 = vsel %vm420_vm0, %v418_v51, 0.0 }
  0x39   : > { %479 = vadd.xlane.f32.xlu1 %v478_v63  ;;  %476 = vadd.xlane.f32.xlu0 %v475_v3 }
  0x3d   : > { %485 = vadd.xlane.f32.xlu1 %v484_v12  ;;  %482 = vadd.xlane.f32.xlu0 %v481_v13 }
  0x41   : > { %491 = vadd.xlane.f32.xlu1 %v490_v20  ;;  %488 = vadd.xlane.f32.xlu0 %v487_v21 }
  0x45   : > { %497 = vadd.xlane.f32.xlu1 %v496_v30  ;;  %494 = vadd.xlane.f32.xlu0 %v493_v31 }
  0x49   : > { %503 = vadd.xlane.f32.xlu1 %v502_v38  ;;  %500 = vadd.xlane.f32.xlu0 %v499_v39 }
  0x4d   : > { %509 = vadd.xlane.f32.xlu1 %v508_v48  ;;  %506 = vadd.xlane.f32.xlu0 %v505_v49 }
  0x51   : > { %515 = vadd.xlane.f32.xlu1 %v514_v54  ;;  %512 = vadd.xlane.f32.xlu0 %v511_v55  ;;  %v2343_v55 = vld [vmem:[%s2594_s1] ss:$0 sm:$0xff] }
  0x9e   : > { %v429_v56 = vpop.xlane.xlu1 %428  ;;  %v423_v57 = vpop.xlane.xlu0 %422 }
  0x9f   : > { %v519_v60 = vmax.f32 %v429_v56, 1e-24  ;;  %v517_v61 = vmax.f32 %v423_v57, 1e-24 }
  0xa1   : > { %1961 = vrsqrt.f32 %v519_v60 }
  0xa2   : > { %1963 = vrsqrt.f32 %v517_v61  ;;  %v432_v63 = vpop.xlane.xlu1 %431  ;;  %v426_v3 = vpop.xlane.xlu0 %425 }
  0xa3   : > { %v520_v4 = vmax.f32 %v432_v63, 1e-24  ;;  %v518_v5 = vmax.f32 %v426_v3, 1e-24 }
  0xa5   : > { %1965 = vrsqrt.f32 %v520_v4 }
  0xa6   : > { %1967 = vrsqrt.f32 %v518_v5  ;;  %v438_v10 = vpop.xlane.xlu1 %437  ;;  %v435_v11 = vpop.xlane.xlu0 %434 }
  0xa7   : > { %v522_v12 = vmax.f32 %v438_v10, 1e-24  ;;  %v521_v13 = vmax.f32 %v435_v11, 1e-24 }
  0xa9   : > { %1969 = vrsqrt.f32 %v522_v12 }
  0xaa   : > { %1971 = vrsqrt.f32 %v521_v13  ;;  %v444_v14 = vpop.xlane.xlu1 %443  ;;  %v441_v15 = vpop.xlane.xlu0 %440 }
  0xab   : > { %v524_v20 = vmax.f32 %v444_v14, 1e-24  ;;  %v523_v21 = vmax.f32 %v441_v15, 1e-24 }
  0xad   : > { %1973 = vrsqrt.f32 %v524_v20 }
  0xae   : > { %v1962_v24 = vpop.eup %1961  ;;  %1975 = vrsqrt.f32 %v523_v21  ;;  %v450_v25 = vpop.xlane.xlu1 %449 }
  0xaf   : > { %v447_v30 = vpop.xlane.xlu0 %446  ;;  %v1964_v31 = vpop.eup %1963  ;;  %v526_v32 = vmax.f32 %v450_v25, 1e-24  ;;  %v583_v38 = vmul.f32 %v1962_v24, %v2136_v0 }
  0xb0   : > { %v525_v33 = vmax.f32 %v447_v30, 1e-24  ;;  %v581_v39 = vmul.f32 %v1964_v31, %v2139_v1 }
  0xb1   : > { %1977 = vrsqrt.f32 %v526_v32  ;;  %v615_v49 = vmul.f32 5.656854, %v583_v38 }
  0xb2   : > { %v1966_v42 = vpop.eup %1965  ;;  %1979 = vrsqrt.f32 %v525_v33  ;;  %v456_v43 = vpop.xlane.xlu1 %455  ;;  %v613_v57 = vmul.f32 5.656854, %v581_v39 }
  0xb3   : > { %v453_v48 = vpop.xlane.xlu0 %452  ;;  %v1968_v50 = vpop.eup %1967  ;;  %v528_v51 = vmax.f32 %v456_v43, 1e-24  ;;  %v584_v56 = vmul.f32 %v1966_v42, %v2142_v2  ;;  %v654_v4 = vmul.f32 %v2343_v55, %v615_v49 }
  0xb4   : > { %v527_v54 = vmax.f32 %v453_v48, 1e-24  ;;  %v582_v0 = vmul.f32 %v1968_v50, %v2151_v6  ;;  %v652_v2 = vmul.f32 %v2343_v55, %v613_v57 }
  0xb5   : > { %1981 = vrsqrt.f32 %v528_v51  ;;  %v616_v1 = vmul.f32 5.656854, %v584_v56 }
  0xb6   : > { %v1970_v60 = vpop.eup %1969  ;;  %1983 = vrsqrt.f32 %v527_v54  ;;  %v462_v61 = vpop.xlane.xlu1 %461  ;;  %v614_v3 = vmul.f32 5.656854, %v582_v0 }
  0xb7   : > { %v459_v63 = vpop.xlane.xlu0 %458  ;;  %v1972_v5 = vpop.eup %1971  ;;  %v530_v10 = vmax.f32 %v462_v61, 1e-24  ;;  %v655_v12 = vmul.f32 %v2343_v55, %v616_v1  ;;  %v586_v13 = vmul.f32 %v1970_v60, %v2156_v8 }
  0xb8   : > { %v529_v11 = vmax.f32 %v459_v63, 1e-24  ;;  %v653_v6 = vmul.f32 %v2343_v55, %v614_v3  ;;  %v585_v14 = vmul.f32 %v1972_v5, %v2159_v9 }
  0xb9   : > { %1985 = vrsqrt.f32 %v530_v10  ;;  %v685_v15 = vpack.c.bf16 %v655_v12, %v654_v4  ;;  %v618_v20 = vmul.f32 5.656854, %v586_v13 }
  0xba   : > { %v1974_v21 = vpop.eup %1973  ;;  %1987 = vrsqrt.f32 %v529_v11  ;;  %v468_v24 = vpop.xlane.xlu1 %467  ;;  %v684_v25 = vpack.c.bf16 %v653_v6, %v652_v2  ;;  %v617_v31 = vmul.f32 5.656854, %v585_v14 }
  0xbb   : > { %v465_v30 = vpop.xlane.xlu0 %464  ;;  %v1976_v32 = vpop.eup %1975  ;;  %v532_v33 = vmax.f32 %v468_v24, 1e-24  ;;  %v657_v8 = vmul.f32 %v2343_v55, %v618_v20  ;;  %v588_v39 = vmul.f32 %v1974_v21, %v2170_v16 }
  0xbc   : > { %v531_v38 = vmax.f32 %v465_v30, 1e-24  ;;  %1849 = vmatprep.mubr.msk.bf16.mxu0 %vm420_vm0, %v684_v25  ;;  %1885 = vmatprep.mubr.msk.bf16.mxu1 %vm420_vm0, %v684_v25  ;;  %v656_v9 = vmul.f32 %v2343_v55, %v617_v31  ;;  %v587_v42 = vmul.f32 %v1976_v32, %v2173_v17 }
  0xbd   : > { %1989 = vrsqrt.f32 %v532_v33  ;;  %1850 = vmatmul.mubr.msk.bf16.vlgmr.msra.gmra.mxu0 %vm420_vm0, %v685_v15  ;;  %1886 = vmatmul.mubr.msk.bf16.vlgmr.msra.gmra.mxu1 %vm420_vm0, %v685_v15  ;;  %v620_v43 = vmul.f32 5.656854, %v588_v39 }
  0xbe   : > { %v1978_v48 = vpop.eup %1977  ;;  %1991 = vrsqrt.f32 %v531_v38  ;;  %v474_v49 = vpop.xlane.xlu1 %473  ;;  %v686_v51 = vpack.c.bf16 %v657_v8, %v656_v9  ;;  %v619_v16 = vmul.f32 5.656854, %v587_v42 }
  0xbf   : > { %v471_v50 = vpop.xlane.xlu0 %470  ;;  %v1980_v54 = vpop.eup %1979  ;;  %v534_v56 = vmax.f32 %v474_v49, 1e-24  ;;  %v659_v57 = vmul.f32 %v2343_v55, %v620_v43  ;;  %v590_v1 = vmul.f32 %v1978_v48, %v2182_v22 }
  0xc0   : > { %v533_v0 = vmax.f32 %v471_v50, 1e-24  ;;  %1853 = vmatprep.mubr.msk.bf16.mxu0 %vm420_vm0, %v686_v51  ;;  %1889 = vmatprep.mubr.msk.bf16.mxu1 %vm420_vm0, %v686_v51  ;;  %v658_v17 = vmul.f32 %v2343_v55, %v619_v16  ;;  %v589_v60 = vmul.f32 %v1980_v54, %v2185_v23 }
  0xc1   : > { %1993 = vrsqrt.f32 %v534_v56  ;;  %v622_v61 = vmul.f32 5.656854, %v590_v1 }
  0xc2   : > { %v1982_v63 = vpop.eup %1981  ;;  %1995 = vrsqrt.f32 %v533_v0  ;;  %v480_v3 = vpop.xlane.xlu1 %479  ;;  %v687_v5 = vpack.c.bf16 %v659_v57, %v658_v17  ;;  %v621_v10 = vmul.f32 5.656854, %v589_v60 }
  0xc3   : > { %v477_v4 = vpop.xlane.xlu0 %476  ;;  %v1984_v11 = vpop.eup %1983  ;;  %v536_v12 = vmax.f32 %v480_v3, 1e-24  ;;  %v661_v22 = vmul.f32 %v2343_v55, %v622_v61  ;;  %v592_v2 = vmul.f32 %v1982_v63, %v2194_v28 }
  0xc4   : > { %v535_v13 = vmax.f32 %v477_v4, 1e-24  ;;  %v660_v6 = vmul.f32 %v2343_v55, %v621_v10  ;;  %v591_v14 = vmul.f32 %v1984_v11, %v2197_v29 }
  0xc5   : > { %1997 = vrsqrt.f32 %v536_v12  ;;  %1854 = vmatmul.mubr.msk.bf16.gmra.mxu0 %vm420_vm0, %v687_v5  ;;  %1890 = vmatmul.mubr.msk.bf16.gmra.mxu1 %vm420_vm0, %v687_v5  ;;  %v624_v23 = vmul.f32 5.656854, %v592_v2 }
  0xc6   : > { %v1986_v15 = vpop.eup %1985  ;;  %1999 = vrsqrt.f32 %v535_v13  ;;  %v486_v20 = vpop.xlane.xlu1 %485  ;;  %v688_v24 = vpack.c.bf16 %v661_v22, %v660_v6  ;;  %v623_v25 = vmul.f32 5.656854, %v591_v14 }
  0xc7   : > { %v483_v21 = vpop.xlane.xlu0 %482  ;;  %v1988_v30 = vpop.eup %1987  ;;  %v538_v31 = vmax.f32 %v486_v20, 1e-24  ;;  %v663_v28 = vmul.f32 %v2343_v55, %v624_v23  ;;  %v594_v33 = vmul.f32 %v1986_v15, %v2206_v34 }
  0xc8   : > { %v537_v32 = vmax.f32 %v483_v21, 1e-24  ;;  %1857 = vmatprep.mubr.msk.bf16.mxu0 %vm420_vm0, %v688_v24  ;;  %1893 = vmatprep.mubr.msk.bf16.mxu1 %vm420_vm0, %v688_v24  ;;  %v662_v29 = vmul.f32 %v2343_v55, %v623_v25  ;;  %v593_v38 = vmul.f32 %v1988_v30, %v2209_v35 }
  0xc9   : > { %2001 = vrsqrt.f32 %v538_v31  ;;  %v626_v8 = vmul.f32 5.656854, %v594_v33 }
  0xca   : > { %v1990_v39 = vpop.eup %1989  ;;  %2003 = vrsqrt.f32 %v537_v32  ;;  %v492_v9 = vpop.xlane.xlu1 %491  ;;  %v689_v43 = vpack.c.bf16 %v663_v28, %v662_v29  ;;  %v625_v48 = vmul.f32 5.656854, %v593_v38 }
  0xcb   : > { %v489_v42 = vpop.xlane.xlu0 %488  ;;  %v1992_v49 = vpop.eup %1991  ;;  %v540_v50 = vmax.f32 %v492_v9, 1e-24  ;;  %v665_v34 = vmul.f32 %v2343_v55, %v626_v8  ;;  %v596_v16 = vmul.f32 %v1990_v39, %v2218_v40 }
  0xcc   : > { %v539_v51 = vmax.f32 %v489_v42, 1e-24  ;;  %v664_v54 = vmul.f32 %v2343_v55, %v625_v48  ;;  %v595_v56 = vmul.f32 %v1992_v49, %v2221_v41 }
  0xcd   : > { %2005 = vrsqrt.f32 %v540_v50  ;;  %1858 = vmatmul.mubr.msk.bf16.gmra.mxu0 %vm420_vm0, %v689_v43  ;;  %1894 = vmatmul.mubr.msk.bf16.gmra.mxu1 %vm420_vm0, %v689_v43  ;;  %v628_v35 = vmul.f32 5.656854, %v596_v16 }
  0xce   : > { %v1994_v0 = vpop.eup %1993  ;;  %2007 = vrsqrt.f32 %v539_v51  ;;  %v498_v57 = vpop.xlane.xlu1 %497  ;;  %v690_v17 = vpack.c.bf16 %v665_v34, %v664_v54  ;;  %v627_v60 = vmul.f32 5.656854, %v595_v56 }
  0xcf   : > { %v495_v1 = vpop.xlane.xlu0 %494  ;;  %v1996_v61 = vpop.eup %1995  ;;  %v542_v63 = vmax.f32 %v498_v57, 1e-24  ;;  %v667_v40 = vmul.f32 %v2343_v55, %v628_v35  ;;  %v598_v4 = vmul.f32 %v1994_v0, %v2230_v46 }
  0xd0   : > { %v541_v3 = vmax.f32 %v495_v1, 1e-24  ;;  %1861 = vmatprep.mubr.msk.bf16.mxu0 %vm420_vm0, %v690_v17  ;;  %1897 = vmatprep.mubr.msk.bf16.mxu1 %vm420_vm0, %v690_v17  ;;  %v666_v41 = vmul.f32 %v2343_v55, %v627_v60  ;;  %v597_v5 = vmul.f32 %v1996_v61, %v2233_v47 }
  0xd1   : > { %2009 = vrsqrt.f32 %v542_v63  ;;  %v630_v10 = vmul.f32 5.656854, %v598_v4 }
  0xd2   : > { %v1998_v11 = vpop.eup %1997  ;;  %2011 = vrsqrt.f32 %v541_v3  ;;  %v504_v12 = vpop.xlane.xlu1 %503  ;;  %v691_v22 = vpack.c.bf16 %v667_v40, %v666_v41  ;;  %v629_v2 = vmul.f32 5.656854, %v597_v5 }
  0xd3   : > { %v501_v13 = vpop.xlane.xlu0 %500  ;;  %v2000_v6 = vpop.eup %1999  ;;  %v544_v14 = vmax.f32 %v504_v12, 1e-24  ;;  %v669_v46 = vmul.f32 %v2343_v55, %v630_v10  ;;  %v600_v15 = vmul.f32 %v1998_v11, %v2243_v52 }
  0xd4   : > { %v543_v23 = vmax.f32 %v501_v13, 1e-24  ;;  %v668_v20 = vmul.f32 %v2343_v55, %v629_v2  ;;  %v599_v21 = vmul.f32 %v2000_v6, %v2246_v53 }
  0xd5   : > { %2013 = vrsqrt.f32 %v544_v14  ;;  %1862 = vmatmul.mubr.msk.bf16.gmra.mxu0 %vm420_vm0, %v691_v22  ;;  %1898 = vmatmul.mubr.msk.bf16.gmra.mxu1 %vm420_vm0, %v691_v22  ;;  %v632_v47 = vmul.f32 5.656854, %v600_v15 }
  0xd6   : > { %v2002_v24 = vpop.eup %2001  ;;  %2015 = vrsqrt.f32 %v543_v23  ;;  %v510_v25 = vpop.xlane.xlu1 %509  ;;  %v692_v31 = vpack.c.bf16 %v669_v46, %v668_v20  ;;  %v631_v32 = vmul.f32 5.656854, %v599_v21 }
  0xd7   : > { %v507_v30 = vpop.xlane.xlu0 %506  ;;  %v2004_v28 = vpop.eup %2003  ;;  %v546_v33 = vmax.f32 %v510_v25, 1e-24  ;;  %v671_v52 = vmul.f32 %v2343_v55, %v632_v47  ;;  %v602_v38 = vmul.f32 %v2002_v24, %v2256_v58 }
  0xd8   : > { %v545_v29 = vmax.f32 %v507_v30, 1e-24  ;;  %1865 = vmatprep.mubr.msk.bf16.mxu0 %vm420_vm0, %v692_v31  ;;  %1901 = vmatprep.mubr.msk.bf16.mxu1 %vm420_vm0, %v692_v31  ;;  %v670_v53 = vmul.f32 %v2343_v55, %v631_v32  ;;  %v601_v8 = vmul.f32 %v2004_v28, %v2259_v59 }
  0xd9   : > { %2017 = vrsqrt.f32 %v546_v33  ;;  %v634_v39 = vmul.f32 5.656854, %v602_v38 }
  0xda   : > { %v2006_v9 = vpop.eup %2005  ;;  %2019 = vrsqrt.f32 %v545_v29  ;;  %v516_v42 = vpop.xlane.xlu1 %515  ;;  %v693_v48 = vpack.c.bf16 %v671_v52, %v670_v53  ;;  %v633_v49 = vmul.f32 5.656854, %v601_v8 }
  0xdb   : > { %v513_v43 = vpop.xlane.xlu0 %512  ;;  %v2008_v50 = vpop.eup %2007  ;;  %v548_v51 = vmax.f32 %v516_v42, 1e-24  ;;  %v673_v58 = vmul.f32 %v2343_v55, %v634_v39  ;;  %v604_v16 = vmul.f32 %v2006_v9, %v2268_v62 }
  0xdc   : > { %v547_v34 = vmax.f32 %v513_v43, 1e-24  ;;  %v672_v54 = vmul.f32 %v2343_v55, %v633_v49  ;;  %v603_v56 = vmul.f32 %v2008_v50, %v2278_v7 }
  0xdd   : > { %2021 = vrsqrt.f32 %v548_v51  ;;  %1866 = vmatmul.mubr.msk.bf16.gmra.mxu0 %vm420_vm0, %v693_v48  ;;  %1902 = vmatmul.mubr.msk.bf16.gmra.mxu1 %vm420_vm0, %v693_v48  ;;  %v636_v59 = vmul.f32 5.656854, %v604_v16 }
  0xde   : > { %v2010_v35 = vpop.eup %2009  ;;  %2023 = vrsqrt.f32 %v547_v34  ;;  %v694_v0 = vpack.c.bf16 %v673_v58, %v672_v54  ;;  %v635_v57 = vmul.f32 5.656854, %v603_v56 }
  0xdf   : > { %v2012_v1 = vpop.eup %2011  ;;  %v675_v17 = vmul.f32 %v2343_v55, %v636_v59  ;;  %v606_v60 = vmul.f32 %v2010_v35, %v2289_v18 }
  0xe0   : > { %1869 = vmatprep.mubr.msk.bf16.mxu0 %vm420_vm0, %v694_v0  ;;  %1905 = vmatprep.mubr.msk.bf16.mxu1 %vm420_vm0, %v694_v0  ;;  %v674_v62 = vmul.f32 %v2343_v55, %v635_v57  ;;  %v605_v7 = vmul.f32 %v2012_v1, %v2292_v19 }
  0xe1   : > { %v638_v61 = vmul.f32 5.656854, %v606_v60 }
  0xe2   : > { %v2014_v63 = vpop.eup %2013  ;;  %v695_v3 = vpack.c.bf16 %v675_v17, %v674_v62  ;;  %v637_v40 = vmul.f32 5.656854, %v605_v7 }
  0xe3   : > { %v2016_v4 = vpop.eup %2015  ;;  %v677_v41 = vmul.f32 %v2343_v55, %v638_v61  ;;  %v608_v5 = vmul.f32 %v2014_v63, %v2301_v26 }
  0xe4   : > { %v676_v10 = vmul.f32 %v2343_v55, %v637_v40  ;;  %v607_v18 = vmul.f32 %v2016_v4, %v2304_v27 }
  0xe5   : > { %1870 = vmatmul.mubr.msk.bf16.gmra.mxu0 %vm420_vm0, %v695_v3  ;;  %1906 = vmatmul.mubr.msk.bf16.gmra.mxu1 %vm420_vm0, %v695_v3  ;;  %v640_v11 = vmul.f32 5.656854, %v608_v5 }
  0xe6   : > { %v2018_v12 = vpop.eup %2017  ;;  %v696_v19 = vpack.c.bf16 %v677_v41, %v676_v10  ;;  %v639_v13 = vmul.f32 5.656854, %v607_v18 }
  0xe7   : > { %v2020_v22 = vpop.eup %2019  ;;  %v679_v2 = vmul.f32 %v2343_v55, %v640_v11  ;;  %v610_v6 = vmul.f32 %v2018_v12, %v2313_v36 }
  0xe8   : > { %1873 = vmatprep.mubr.msk.bf16.mxu0 %vm420_vm0, %v696_v19  ;;  %1909 = vmatprep.mubr.msk.bf16.mxu1 %vm420_vm0, %v696_v19  ;;  %v678_v26 = vmul.f32 %v2343_v55, %v639_v13  ;;  %v609_v27 = vmul.f32 %v2020_v22, %v2316_v37 }
  0xe9   : > { %v642_v14 = vmul.f32 5.656854, %v610_v6 }
  0xea   : > { %v2022_v23 = vpop.eup %2021  ;;  %v697_v46 = vpack.c.bf16 %v679_v2, %v678_v26  ;;  %v641_v15 = vmul.f32 5.656854, %v609_v27 }
  0xeb   : > { %v2024_v20 = vpop.eup %2023  ;;  %v681_v21 = vmul.f32 %v2343_v55, %v642_v14  ;;  %v612_v47 = vmul.f32 %v2022_v23, %v2325_v44 }
  0xec   : > { %v680_v36 = vmul.f32 %v2343_v55, %v641_v15  ;;  %v611_v24 = vmul.f32 %v2024_v20, %v2328_v45 }
  0xed   : > { %1874 = vmatmul.mubr.msk.bf16.gmra.mxu0 %vm420_vm0, %v697_v46  ;;  %1910 = vmatmul.mubr.msk.bf16.gmra.mxu1 %vm420_vm0, %v697_v46  ;;  %v644_v25 = vmul.f32 5.656854, %v612_v47 }
  0xee   : > { %v698_v37 = vpack.c.bf16 %v681_v21, %v680_v36  ;;  %v643_v30 = vmul.f32 5.656854, %v611_v24 }
  0xef   : > { %v683_v31 = vmul.f32 %v2343_v55, %v644_v25 }
  0xf0   : > { %1877 = vmatprep.mubr.msk.bf16.mxu0 %vm420_vm0, %v698_v37  ;;  %1913 = vmatprep.mubr.msk.bf16.mxu1 %vm420_vm0, %v698_v37  ;;  %v682_v32 = vmul.f32 %v2343_v55, %v643_v30 }
  0xf2   : > { %v699_v44 = vpack.c.bf16 %v683_v31, %v682_v32 }
  0xf5   : > { %1878 = vmatmul.mubr.msk.bf16.gmra.mxu0 %vm420_vm0, %v699_v44  ;;  %1914 = vmatmul.mubr.msk.bf16.gmra.mxu1 %vm420_vm0, %v699_v44 }
 0x17d   : > { %v1851_v45 = vpop.f32.mrf.mxu0  ;;  %v1887_v55 = vpop.f32.mrf.mxu1 }
 0x17e   : > { %v1747_v28 = vpack.c.bf16 %v1851_v45, %v1851_v45  ;;  %v1779_v33 = vpack.c.bf16 %v1887_v55, %v1887_v55 }
 0x17f   : > { %v798_v29 = vpop.f32.mrf.mxu0  ;;  %v1136_v52 = vpop.f32.mrf.mxu1 }
 0x180   : > { %1056 = vst.msk [vmem:[%s2443_s19 + $0x8] sm:$0xf] %vm1053_vm1, %v1747_v28  ;;  %1393 = vst.msk [vmem:[%s2448_s27 + $0x8] sm:$0xf] %vm1053_vm1, %v1779_v33  ;;  %v1745_v38 = vpack.c.bf16 %v798_v29, %v798_v29  ;;  %v1777_v53 = vpack.c.bf16 %v1136_v52, %v1136_v52 }
 0x181   : > { %v1852_v8 = vpop.f32.mrf.mxu0  ;;  %v1888_v39 = vpop.f32.mrf.mxu1 }
 0x182   : > { %1054 = vst.msk [vmem:[%s2443_s19] sm:$0xf] %vm1053_vm1, %v1745_v38  ;;  %1391 = vst.msk [vmem:[%s2448_s27] sm:$0xf] %vm1053_vm1, %v1777_v53  ;;  %v1748_v9 = vpack.c.bf16 %v1852_v8, %v1852_v8  ;;  %v1780_v42 = vpack.c.bf16 %v1888_v39, %v1888_v39 }
 0x183   : > { %v801_v43 = vpop.f32.mrf.mxu0  ;;  %v1139_v48 = vpop.f32.mrf.mxu1 }
 0x184   : > { %1057 = vst.msk [vmem:[%s2443_s19 + $0xc] sm:$0xf] %vm1053_vm1, %v1748_v9  ;;  %1394 = vst.msk [vmem:[%s2448_s27 + $0xc] sm:$0xf] %vm1053_vm1, %v1780_v42  ;;  %v1746_v49 = vpack.c.bf16 %v801_v43, %v801_v43  ;;  %v1778_v50 = vpack.c.bf16 %v1139_v48, %v1139_v48 }
 0x185   : > { %v1855_v51 = vpop.f32.mrf.mxu0  ;;  %v1891_v34 = vpop.f32.mrf.mxu1 }
 0x186   : > { %1055 = vst.msk [vmem:[%s2443_s19 + $0x4] sm:$0xf] %vm1053_vm1, %v1746_v49  ;;  %1392 = vst.msk [vmem:[%s2448_s27 + $0x4] sm:$0xf] %vm1053_vm1, %v1778_v50  ;;  %v1751_v58 = vpack.c.bf16 %v1855_v51, %v1855_v51  ;;  %v1783_v16 = vpack.c.bf16 %v1891_v34, %v1891_v34 }
 0x187   : > { %v814_v54 = vpop.f32.mrf.mxu0  ;;  %v1152_v56 = vpop.f32.mrf.mxu1 }
 0x188   : > { %1060 = vst.msk [vmem:[%s2443_s19 + $0x18] sm:$0xf] %vm1053_vm1, %v1751_v58  ;;  %1397 = vst.msk [vmem:[%s2448_s27 + $0x18] sm:$0xf] %vm1053_vm1, %v1783_v16  ;;  %v1749_v59 = vpack.c.bf16 %v814_v54, %v814_v54  ;;  %v1781_v35 = vpack.c.bf16 %v1152_v56, %v1152_v56 }
 0x189   : > { %v1856_v0 = vpop.f32.mrf.mxu0  ;;  %v1892_v57 = vpop.f32.mrf.mxu1 }
 0x18a   : > { %1058 = vst.msk [vmem:[%s2443_s19 + $0x10] sm:$0xf] %vm1053_vm1, %v1749_v59  ;;  %1395 = vst.msk [vmem:[%s2448_s27 + $0x10] sm:$0xf] %vm1053_vm1, %v1781_v35  ;;  %v1752_v1 = vpack.c.bf16 %v1856_v0, %v1856_v0  ;;  %v1784_v17 = vpack.c.bf16 %v1892_v57, %v1892_v57 }
 0x18b   : > { %v817_v60 = vpop.f32.mrf.mxu0  ;;  %v1155_v62 = vpop.f32.mrf.mxu1 }
 0x18c   : > { %1061 = vst.msk [vmem:[%s2443_s19 + $0x1c] sm:$0xf] %vm1053_vm1, %v1752_v1  ;;  %1398 = vst.msk [vmem:[%s2448_s27 + $0x1c] sm:$0xf] %vm1053_vm1, %v1784_v17  ;;  %v1750_v7 = vpack.c.bf16 %v817_v60, %v817_v60  ;;  %v1782_v61 = vpack.c.bf16 %v1155_v62, %v1155_v62 }
 0x18d   : > { %v1859_v63 = vpop.f32.mrf.mxu0  ;;  %v1895_v3 = vpop.f32.mrf.mxu1 }
 0x18e   : > { %1059 = vst.msk [vmem:[%s2443_s19 + $0x14] sm:$0xf] %vm1053_vm1, %v1750_v7  ;;  %1396 = vst.msk [vmem:[%s2448_s27 + $0x14] sm:$0xf] %vm1053_vm1, %v1782_v61  ;;  %v1755_v40 = vpack.c.bf16 %v1859_v63, %v1859_v63  ;;  %v1787_v4 = vpack.c.bf16 %v1895_v3, %v1895_v3 }
 0x18f   : > { %v830_v41 = vpop.f32.mrf.mxu0  ;;  %v1168_v5 = vpop.f32.mrf.mxu1 }
 0x190   : > { %1064 = vst.msk [vmem:[%s2443_s19 + $0x28] sm:$0xf] %vm1053_vm1, %v1755_v40  ;;  %1401 = vst.msk [vmem:[%s2448_s27 + $0x28] sm:$0xf] %vm1053_vm1, %v1787_v4  ;;  %v1753_v10 = vpack.c.bf16 %v830_v41, %v830_v41  ;;  %v1785_v18 = vpack.c.bf16 %v1168_v5, %v1168_v5 }
 0x191   : > { %v1860_v11 = vpop.f32.mrf.mxu0  ;;  %v1896_v12 = vpop.f32.mrf.mxu1 }
 0x192   : > { %1062 = vst.msk [vmem:[%s2443_s19 + $0x20] sm:$0xf] %vm1053_vm1, %v1753_v10  ;;  %1399 = vst.msk [vmem:[%s2448_s27 + $0x20] sm:$0xf] %vm1053_vm1, %v1785_v18  ;;  %v1756_v19 = vpack.c.bf16 %v1860_v11, %v1860_v11  ;;  %v1788_v13 = vpack.c.bf16 %v1896_v12, %v1896_v12 }
 0x193   : > { %v833_v22 = vpop.f32.mrf.mxu0  ;;  %v1171_v2 = vpop.f32.mrf.mxu1 }
 0x194   : > { %1065 = vst.msk [vmem:[%s2443_s19 + $0x2c] sm:$0xf] %vm1053_vm1, %v1756_v19  ;;  %1402 = vst.msk [vmem:[%s2448_s27 + $0x2c] sm:$0xf] %vm1053_vm1, %v1788_v13  ;;  %v1754_v6 = vpack.c.bf16 %v833_v22, %v833_v22  ;;  %v1786_v26 = vpack.c.bf16 %v1171_v2, %v1171_v2 }
 0x195   : > { %v1863_v27 = vpop.f32.mrf.mxu0  ;;  %v1899_v14 = vpop.f32.mrf.mxu1 }
 0x196   : > { %1063 = vst.msk [vmem:[%s2443_s19 + $0x24] sm:$0xf] %vm1053_vm1, %v1754_v6  ;;  %1400 = vst.msk [vmem:[%s2448_s27 + $0x24] sm:$0xf] %vm1053_vm1, %v1786_v26  ;;  %v1759_v23 = vpack.c.bf16 %v1863_v27, %v1863_v27  ;;  %v1791_v46 = vpack.c.bf16 %v1899_v14, %v1899_v14 }
 0x197   : > { %v846_v15 = vpop.f32.mrf.mxu0  ;;  %v1184_v20 = vpop.f32.mrf.mxu1 }
 0x198   : > { %1068 = vst.msk [vmem:[%s2443_s19 + $0x38] sm:$0xf] %vm1053_vm1, %v1759_v23  ;;  %1405 = vst.msk [vmem:[%s2448_s27 + $0x38] sm:$0xf] %vm1053_vm1, %v1791_v46  ;;  %v1757_v21 = vpack.c.bf16 %v846_v15, %v846_v15  ;;  %v1789_v47 = vpack.c.bf16 %v1184_v20, %v1184_v20 }
 0x199   : > { %v1864_v36 = vpop.f32.mrf.mxu0  ;;  %v1900_v24 = vpop.f32.mrf.mxu1 }
 0x19a   : > { %1066 = vst.msk [vmem:[%s2443_s19 + $0x30] sm:$0xf] %vm1053_vm1, %v1757_v21  ;;  %1403 = vst.msk [vmem:[%s2448_s27 + $0x30] sm:$0xf] %vm1053_vm1, %v1789_v47  ;;  %v1760_v25 = vpack.c.bf16 %v1864_v36, %v1864_v36  ;;  %v1792_v37 = vpack.c.bf16 %v1900_v24, %v1900_v24 }
 0x19b   : > { %v849_v30 = vpop.f32.mrf.mxu0  ;;  %v1187_v31 = vpop.f32.mrf.mxu1 }
 0x19c   : > { %1069 = vst.msk [vmem:[%s2443_s19 + $0x3c] sm:$0xf] %vm1053_vm1, %v1760_v25  ;;  %1406 = vst.msk [vmem:[%s2448_s27 + $0x3c] sm:$0xf] %vm1053_vm1, %v1792_v37  ;;  %v1758_v32 = vpack.c.bf16 %v849_v30, %v849_v30  ;;  %v1790_v44 = vpack.c.bf16 %v1187_v31, %v1187_v31 }
 0x19d   : > { %v1867_v45 = vpop.f32.mrf.mxu0  ;;  %v1903_v55 = vpop.f32.mrf.mxu1 }
 0x19e   : > { %1067 = vst.msk [vmem:[%s2443_s19 + $0x34] sm:$0xf] %vm1053_vm1, %v1758_v32  ;;  %1404 = vst.msk [vmem:[%s2448_s27 + $0x34] sm:$0xf] %vm1053_vm1, %v1790_v44  ;;  %v1763_v28 = vpack.c.bf16 %v1867_v45, %v1867_v45  ;;  %v1795_v33 = vpack.c.bf16 %v1903_v55, %v1903_v55 }
 0x19f   : > { %v862_v29 = vpop.f32.mrf.mxu0  ;;  %v1200_v52 = vpop.f32.mrf.mxu1 }
 0x1a0   : > { %1072 = vst.msk [vmem:[%s2443_s19 + $0x48] sm:$0xf] %vm1053_vm1, %v1763_v28  ;;  %1409 = vst.msk [vmem:[%s2448_s27 + $0x48] sm:$0xf] %vm1053_vm1, %v1795_v33  ;;  %v1761_v38 = vpack.c.bf16 %v862_v29, %v862_v29  ;;  %v1793_v53 = vpack.c.bf16 %v1200_v52, %v1200_v52 }
 0x1a1   : > { %v1868_v8 = vpop.f32.mrf.mxu0  ;;  %v1904_v39 = vpop.f32.mrf.mxu1 }
 0x1a2   : > { %1070 = vst.msk [vmem:[%s2443_s19 + $0x40] sm:$0xf] %vm1053_vm1, %v1761_v38  ;;  %1407 = vst.msk [vmem:[%s2448_s27 + $0x40] sm:$0xf] %vm1053_vm1, %v1793_v53  ;;  %v1764_v9 = vpack.c.bf16 %v1868_v8, %v1868_v8  ;;  %v1796_v42 = vpack.c.bf16 %v1904_v39, %v1904_v39 }
 0x1a3   : > { %v865_v43 = vpop.f32.mrf.mxu0  ;;  %v1203_v48 = vpop.f32.mrf.mxu1 }
 0x1a4   : > { %1073 = vst.msk [vmem:[%s2443_s19 + $0x4c] sm:$0xf] %vm1053_vm1, %v1764_v9  ;;  %1410 = vst.msk [vmem:[%s2448_s27 + $0x4c] sm:$0xf] %vm1053_vm1, %v1796_v42  ;;  %v1762_v49 = vpack.c.bf16 %v865_v43, %v865_v43  ;;  %v1794_v50 = vpack.c.bf16 %v1203_v48, %v1203_v48 }
 0x1a5   : > { %v1871_v51 = vpop.f32.mrf.mxu0  ;;  %v1907_v34 = vpop.f32.mrf.mxu1 }
 0x1a6   : > { %1071 = vst.msk [vmem:[%s2443_s19 + $0x44] sm:$0xf] %vm1053_vm1, %v1762_v49  ;;  %1408 = vst.msk [vmem:[%s2448_s27 + $0x44] sm:$0xf] %vm1053_vm1, %v1794_v50  ;;  %v1767_v58 = vpack.c.bf16 %v1871_v51, %v1871_v51  ;;  %v1799_v16 = vpack.c.bf16 %v1907_v34, %v1907_v34 }
 0x1a7   : > { %v878_v54 = vpop.f32.mrf.mxu0  ;;  %v1216_v56 = vpop.f32.mrf.mxu1 }
 0x1a8   : > { %1076 = vst.msk [vmem:[%s2443_s19 + $0x58] sm:$0xf] %vm1053_vm1, %v1767_v58  ;;  %1413 = vst.msk [vmem:[%s2448_s27 + $0x58] sm:$0xf] %vm1053_vm1, %v1799_v16  ;;  %v1765_v59 = vpack.c.bf16 %v878_v54, %v878_v54  ;;  %v1797_v35 = vpack.c.bf16 %v1216_v56, %v1216_v56 }
 0x1a9   : > { %v1872_v0 = vpop.f32.mrf.mxu0  ;;  %v1908_v57 = vpop.f32.mrf.mxu1 }
 0x1aa   : > { %1074 = vst.msk [vmem:[%s2443_s19 + $0x50] sm:$0xf] %vm1053_vm1, %v1765_v59  ;;  %1411 = vst.msk [vmem:[%s2448_s27 + $0x50] sm:$0xf] %vm1053_vm1, %v1797_v35  ;;  %v1768_v1 = vpack.c.bf16 %v1872_v0, %v1872_v0  ;;  %v1800_v17 = vpack.c.bf16 %v1908_v57, %v1908_v57 }
 0x1ab   : > { %v881_v60 = vpop.f32.mrf.mxu0  ;;  %v1219_v62 = vpop.f32.mrf.mxu1 }
 0x1ac   : > { %1077 = vst.msk [vmem:[%s2443_s19 + $0x5c] sm:$0xf] %vm1053_vm1, %v1768_v1  ;;  %1414 = vst.msk [vmem:[%s2448_s27 + $0x5c] sm:$0xf] %vm1053_vm1, %v1800_v17  ;;  %v1766_v7 = vpack.c.bf16 %v881_v60, %v881_v60  ;;  %v1798_v61 = vpack.c.bf16 %v1219_v62, %v1219_v62 }
 0x1ad   : > { %v1875_v63 = vpop.f32.mrf.mxu0  ;;  %v1911_v3 = vpop.f32.mrf.mxu1 }
 0x1ae   : > { %1075 = vst.msk [vmem:[%s2443_s19 + $0x54] sm:$0xf] %vm1053_vm1, %v1766_v7  ;;  %1412 = vst.msk [vmem:[%s2448_s27 + $0x54] sm:$0xf] %vm1053_vm1, %v1798_v61  ;;  %v1771_v40 = vpack.c.bf16 %v1875_v63, %v1875_v63  ;;  %v1803_v4 = vpack.c.bf16 %v1911_v3, %v1911_v3 }
 0x1af   : > { %v894_v41 = vpop.f32.mrf.mxu0  ;;  %v1232_v5 = vpop.f32.mrf.mxu1 }
 0x1b0   : > { %1080 = vst.msk [vmem:[%s2443_s19 + $0x68] sm:$0xf] %vm1053_vm1, %v1771_v40  ;;  %1417 = vst.msk [vmem:[%s2448_s27 + $0x68] sm:$0xf] %vm1053_vm1, %v1803_v4  ;;  %v1769_v10 = vpack.c.bf16 %v894_v41, %v894_v41  ;;  %v1801_v18 = vpack.c.bf16 %v1232_v5, %v1232_v5 }
 0x1b1   : > { %v1876_v11 = vpop.f32.mrf.mxu0  ;;  %v1912_v12 = vpop.f32.mrf.mxu1 }
 0x1b2   : > { %1078 = vst.msk [vmem:[%s2443_s19 + $0x60] sm:$0xf] %vm1053_vm1, %v1769_v10  ;;  %1415 = vst.msk [vmem:[%s2448_s27 + $0x60] sm:$0xf] %vm1053_vm1, %v1801_v18  ;;  %v1772_v19 = vpack.c.bf16 %v1876_v11, %v1876_v11  ;;  %v1804_v13 = vpack.c.bf16 %v1912_v12, %v1912_v12 }
 0x1b3   : > { %v897_v22 = vpop.f32.mrf.mxu0  ;;  %v1235_v2 = vpop.f32.mrf.mxu1 }
 0x1b4   : > { %1081 = vst.msk [vmem:[%s2443_s19 + $0x6c] sm:$0xf] %vm1053_vm1, %v1772_v19  ;;  %1418 = vst.msk [vmem:[%s2448_s27 + $0x6c] sm:$0xf] %vm1053_vm1, %v1804_v13  ;;  %v1770_v6 = vpack.c.bf16 %v897_v22, %v897_v22  ;;  %v1802_v26 = vpack.c.bf16 %v1235_v2, %v1235_v2 }
 0x1b5   : > { %v1879_v27 = vpop.f32.mrf.mxu0  ;;  %v1915_v14 = vpop.f32.mrf.mxu1 }
 0x1b6   : > { %1079 = vst.msk [vmem:[%s2443_s19 + $0x64] sm:$0xf] %vm1053_vm1, %v1770_v6  ;;  %1416 = vst.msk [vmem:[%s2448_s27 + $0x64] sm:$0xf] %vm1053_vm1, %v1802_v26  ;;  %v1775_v23 = vpack.c.bf16 %v1879_v27, %v1879_v27  ;;  %v1807_v46 = vpack.c.bf16 %v1915_v14, %v1915_v14 }
 0x1b7   : > { %v910_v15 = vpop.f32.mrf.mxu0  ;;  %v1248_v20 = vpop.f32.mrf.mxu1 }
 0x1b8   : > { %1084 = vst.msk [vmem:[%s2443_s19 + $0x78] sm:$0xf] %vm1053_vm1, %v1775_v23  ;;  %1421 = vst.msk [vmem:[%s2448_s27 + $0x78] sm:$0xf] %vm1053_vm1, %v1807_v46  ;;  %v1773_v21 = vpack.c.bf16 %v910_v15, %v910_v15  ;;  %v1805_v47 = vpack.c.bf16 %v1248_v20, %v1248_v20 }
 0x1b9   : > { %v1880_v36 = vpop.f32.mrf.mxu0  ;;  %v1916_v24 = vpop.f32.mrf.mxu1 }
 0x1ba   : > { %1082 = vst.msk [vmem:[%s2443_s19 + $0x70] sm:$0xf] %vm1053_vm1, %v1773_v21  ;;  %1419 = vst.msk [vmem:[%s2448_s27 + $0x70] sm:$0xf] %vm1053_vm1, %v1805_v47  ;;  %v1776_v25 = vpack.c.bf16 %v1880_v36, %v1880_v36  ;;  %v1808_v37 = vpack.c.bf16 %v1916_v24, %v1916_v24 }
 0x1bb   : > { %v913_v30 = vpop.f32.mrf.mxu0  ;;  %v1251_v31 = vpop.f32.mrf.mxu1 }
 0x1bc   : > { %1085 = vst.msk [vmem:[%s2443_s19 + $0x7c] sm:$0xf] %vm1053_vm1, %v1776_v25  ;;  %1422 = vst.msk [vmem:[%s2448_s27 + $0x7c] sm:$0xf] %vm1053_vm1, %v1808_v37  ;;  %v1774_v32 = vpack.c.bf16 %v913_v30, %v913_v30  ;;  %v1806_v44 = vpack.c.bf16 %v1251_v31, %v1251_v31 }
 0x1be   : > { %1083 = vst.msk [vmem:[%s2443_s19 + $0x74] sm:$0xf] %vm1053_vm1, %v1774_v32  ;;  %1420 = vst.msk [vmem:[%s2448_s27 + $0x74] sm:$0xf] %vm1053_vm1, %v1806_v44 }
 0x1bf PF: > { %s16_s22 = sadd.s32 1, %s2063_s22   ;;  %s2599_s18 = smov %s2055_s20 }
 0x1c0   : > { %p13_p7 = scmp.ge.s32.totalorder %s16_s22, 10   ;;  %s2600_s19 = smov %s2059_s21 }
 0x1c1   : > { %s2601_s20 = smov %s2604_s23  ;;  %s2602_s21 = smov %s2608_s24 }
 0x1c2   :  { %15 = sbr.rel (!%p13_p7) target bundleno = 3 (0x3), region = 84 }

</bundles_post_ra>
